<compile_context>
chip_gen: v7x
topology: tpu7x:2x2x1
jax: 0.10.0
libtpu: 0.0.40
codegen_flags: <defaults>
</compile_context>

<pallas_src>
import functools
import math

import jax
import jax.numpy as jnp
from jax.experimental import pallas as pl
from jax.experimental.pallas import tpu as pltpu

# sqrt(2/pi) * (x + 0.044715 * x^3)  ==  x * (_A + _B * x * x)
_A = math.sqrt(2.0 / math.pi)
_B = _A * 0.044715


def _gelu_kernel(x_ref, o_ref, *, compute_dtype):
    # 0.5 * x * (1 + tanh(sqrt(2/pi) * (x + 0.044715 * x^3)))
    # Folded form: x * (0.5 + 0.5 * tanh(x * (_A + _B * x^2)))
    x = x_ref[...].astype(compute_dtype)
    inner = x * (_A + _B * (x * x))
    o_ref[...] = (x * (0.5 + 0.5 * jnp.tanh(inner))).astype(o_ref.dtype)


def _sublane_align(dtype) -> int:
    # f32 -> 8, bf16/f16 -> 16, int8/fp8 -> 32 (sub-32-bit dtypes pack sublanes).
    itemsize = jnp.dtype(dtype).itemsize
    return max(8, 32 // itemsize)


def _chip_profile():
    """Returns (target_block_bytes, num_tensorcores, bf16_compute_ok)."""
    kind = ""
    try:
        kind = jax.devices()[0].device_kind.lower()
    except Exception:  # pragma: no cover - defensive
        pass
    if "v5" in kind:
        # v5e: 16 MiB scoped-VMEM default, no bf16 VPU/EUP -> f32 compute.
        return 2 * 1024 * 1024, 1, False
    if "v6" in kind:
        # v6e: 32 MiB scoped default, bf16 VALU/EUP, 1 TensorCore.
        return 4 * 1024 * 1024, 1, True
    if "7" in kind:
        # v7x: 32 MiB scoped default (64 MiB physical), 2 TensorCores, 3.2 TB/s.
        return 4 * 1024 * 1024, 2, True
    # Unknown generation: conservative defaults safe under every scoped limit.
    return 2 * 1024 * 1024, 1, False


def _round_up(a: int, m: int) -> int:
    return pl.cdiv(a, m) * m


def _choose_row_tile(rows, cols, itemsize, sublane, target_block_bytes, num_cores):
    """Row-tile size + grid steps; even step count when 2 TensorCores exist."""
    target_rows = max(
        sublane, (target_block_bytes // (cols * itemsize)) // sublane * sublane
    )
    tr = rows if rows <= target_rows else target_rows
    steps = pl.cdiv(rows, tr)

    if num_cores >= 2:
        # Megacore: make sure both TensorCores get blocks (>= 2 steps, even).
        if steps == 1 and rows > sublane:
            half = _round_up(pl.cdiv(rows, 2), sublane)
            if half < rows:
                tr = half
                steps = pl.cdiv(rows, tr)
        if steps > 1 and steps % 2 != 0:
            cand = max(sublane, _round_up(pl.cdiv(rows, steps + 1), sublane))
            if cand < rows and pl.cdiv(rows, cand) % 2 == 0:
                tr = cand
                steps = pl.cdiv(rows, cand)
    return tr, steps


def _run_gelu_2d(x2d, *, compute_dtype, target_block_bytes, num_cores):
    rows, cols = x2d.shape
    dtype = x2d.dtype
    itemsize = jnp.dtype(dtype).itemsize
    sublane = _sublane_align(dtype)
    tr, steps = _choose_row_tile(
        rows, cols, itemsize, sublane, target_block_bytes, num_cores
    )
    kernel = functools.partial(_gelu_kernel, compute_dtype=compute_dtype)
    return pl.pallas_call(
        kernel,
        out_shape=jax.ShapeDtypeStruct((rows, cols), dtype),
        grid_spec=pltpu.PrefetchScalarGridSpec(
            num_scalar_prefetch=0,
            grid=(steps,),
            in_specs=[pl.BlockSpec((tr, cols), lambda i: (i, 0))],
            out_specs=pl.BlockSpec((tr, cols), lambda i: (i, 0)),
        ),
        compiler_params=pltpu.CompilerParams(
            dimension_semantics=("parallel",),
        ),
    )(x2d)


def gelu_pallas(x: jax.Array, *, target_block_bytes: int | None = None) -> jax.Array:
    """tanh-approximation GELU, computed in a Pallas TPU kernel."""
    orig_shape = x.shape
    n = x.size
    if n == 0:
        return x

    block_bytes, num_cores, bf16_ok = _chip_profile()
    if target_block_bytes is None:
        target_block_bytes = block_bytes

    dtype = x.dtype
    itemsize = jnp.dtype(dtype).itemsize
    sublane = _sublane_align(dtype)

    # bf16/f16 compute on chips with a bf16 VPU/EUP (v6e/v7x); f32 otherwise.
    if bf16_ok and jnp.dtype(dtype) in (jnp.dtype(jnp.bfloat16), jnp.dtype(jnp.float16)):
        compute_dtype = dtype
    else:
        compute_dtype = jnp.float32

    run = functools.partial(
        _run_gelu_2d,
        compute_dtype=compute_dtype,
        target_block_bytes=target_block_bytes,
        num_cores=num_cores,
    )

    # Prefer the widest lane-dense column count that divides n AND keeps at
    # least one full sublane group of rows (avoids masked partial stores).
    cols = None
    for c in (4096, 2048, 1024, 512, 256, 128):
        if n % c == 0 and n // c >= sublane:
            cols = c
            break
    if cols is None:
        for c in (4096, 2048, 1024, 512, 256, 128):
            if n % c == 0:
                cols = c
                break

    if cols is not None:
        # Zero-copy reshape path: 1 HBM read + 1 HBM write, nothing else.
        out2d = run(x.reshape(n // cols, cols))
        return out2d.reshape(orig_shape)

    # ---- Fallback: element count not a multiple of 128 ----
    if n * itemsize <= target_block_bytes:
        # Small awkward tensor: one full-extent (1, n) block. Block dims equal
        # the array dims, so no (8,128) divisibility needed and no padding.
        out2d = run(x.reshape(1, n))
        return out2d.reshape(orig_shape)

    # Large awkward tensor: tiled kernel on the largest 1024-divisible prefix,
    # plain-JAX GELU on the tiny (<1024 elem) tail, reassembled once.
    flat = x.reshape(n)
    prefix = (n // 1024) * 1024
    head = run(flat[:prefix].reshape(prefix // 1024, 1024)).reshape(prefix)
    tail = flat[prefix:].astype(jnp.float32)
    tail_out = (tail * (0.5 + 0.5 * jnp.tanh(tail * (_A + _B * tail * tail)))).astype(dtype)
    return jnp.concatenate([head, tail_out]).reshape(orig_shape)


def gelu_ref(x: jax.Array) -> jax.Array:
    return 0.5 * x * (
        1.0 + jnp.tanh(_A * (x + 0.044715 * jnp.power(x, 3)))
    )


if __name__ == "__main__":
    key = jax.random.PRNGKey(0)
    k0, k1, k2 = jax.random.split(key, 3)

    # NCHW-style activation tensor (zero-copy reshape path).
    x = jax.random.normal(k0, (2, 4, 16, 16), dtype=jnp.float32)
    out = gelu_pallas(x)
    jax.block_until_ready(out)
    assert out.shape == x.shape and out.dtype == x.dtype
    assert jnp.allclose(out, gelu_ref(x), atol=1e-5, rtol=1e-5), "mismatch vs reference"

    # Awkward element count (single full-extent block fallback; no padding).
    x2 = jax.random.normal(k1, (3, 5, 7), dtype=jnp.float32)
    out2 = gelu_pallas(x2)
    jax.block_until_ready(out2)
    assert jnp.allclose(out2, gelu_ref(x2), atol=1e-5, rtol=1e-5), "mismatch (fallback)"

    # bf16 path (compute dtype is chip-dependent: bf16 on v6e/v7x, f32 on v5e).
    x3 = jax.random.normal(k2, (2, 8, 32), dtype=jnp.bfloat16)
    out3 = gelu_pallas(x3)
    jax.block_until_ready(out3)
    assert out3.shape == x3.shape and out3.dtype == x3.dtype
    ref3 = gelu_ref(x3.astype(jnp.float32))
    assert jnp.allclose(out3.astype(jnp.float32), ref3, atol=3e-2, rtol=3e-2), "mismatch (bf16)"

    print("KERNEL_OK")
</pallas_src>

<mosaic_0001>
module attributes {stable_mosaic.version = 11 : i64} {
  func.func @_gelu_kernel(%arg0: i32, %arg1: memref<8x256xf32, #tpu.memory_space<vmem>>, %arg2: memref<8x256xf32, #tpu.memory_space<vmem>>) attributes {dimension_semantics = [#tpu.dimension_semantics<parallel>], iteration_bounds = array<i64: 1>, scalar_prefetch = 0 : i64, scratch_operands = 0 : i64, tpu.core_type = #tpu.core_type<tc>, window_params = [{transform_indices = @transform_0, window_bounds = array<i64: 8, 256>}, {transform_indices = @transform_1, window_bounds = array<i64: 8, 256>}]} {
    %c0 = arith.constant 0 : index
    %c0_0 = arith.constant 0 : index
    %0 = vector.load %arg1[%c0, %c0_0] : memref<8x256xf32, #tpu.memory_space<vmem>>, vector<8x256xf32>
    %1 = arith.mulf %0, %0 : vector<8x256xf32>
    %cst = arith.constant 0.0356774069 : f32
    %2 = vector.broadcast %cst : f32 to vector<8x256xf32>
    %3 = arith.mulf %2, %1 : vector<8x256xf32>
    %cst_1 = arith.constant 0.797884583 : f32
    %4 = vector.broadcast %cst_1 : f32 to vector<8x256xf32>
    %5 = arith.addf %4, %3 : vector<8x256xf32>
    %6 = arith.mulf %0, %5 : vector<8x256xf32>
    %7 = math.tanh %6 : vector<8x256xf32>
    %cst_2 = arith.constant 5.000000e-01 : f32
    %8 = vector.broadcast %cst_2 : f32 to vector<8x256xf32>
    %9 = arith.mulf %8, %7 : vector<8x256xf32>
    %cst_3 = arith.constant 5.000000e-01 : f32
    %10 = vector.broadcast %cst_3 : f32 to vector<8x256xf32>
    %11 = arith.addf %10, %9 : vector<8x256xf32>
    %12 = arith.mulf %0, %11 : vector<8x256xf32>
    %c0_4 = arith.constant 0 : index
    %c0_5 = arith.constant 0 : index
    %13 = vector.load %arg2[%c0_4, %c0_5] : memref<8x256xf32, #tpu.memory_space<vmem>>, vector<8x256xf32>
    tpu.vector_store %arg2[%c0_4, %c0_5], %12 {strides = array<i32>} : memref<8x256xf32, #tpu.memory_space<vmem>>, vector<8x256xf32>,
    return
  }
  func.func @transform_0(%arg0: i32) -> (i32, i32) {
    %c0_i32 = arith.constant 0 : i32
    %c0_i32_0 = arith.constant 0 : i32
    return %arg0, %c0_i32 : i32, i32
  }
  func.func @transform_1(%arg0: i32) -> (i32, i32) {
    %c0_i32 = arith.constant 0 : i32
    %c0_i32_0 = arith.constant 0 : i32
    return %arg0, %c0_i32 : i32, i32
  }
}

</mosaic_0001>

<bundles_post_ra>
// kernel: tpu_custom_call.1
= control target key start
LH: loop header
LB: loop body
LE: loop exit
PB: predicated region body
PF: predicated region fallthrough
CT: control target
= control target key end

     0   :  { %6 = vsyncpa [#allocation3], 0  ;;  %s146_s0 = inlined_call_operand.hbm [shape: f32[8,256], index: 0, kind: input, shape index: {}]   ;;  %s147_s1 = inlined_call_operand.hbm [shape: f32[8,256], index: 1, kind: output, shape index: {}]  }
   0x1   :  { %7 = vsyncpa [#allocation4], 0  ;;  %s110_s6 = smov [#allocation2]   ;;  %s62_s10 = scalar_lea.hbm %s146_s0, 256 }
   0x2   :  { %s14_s7 = sshll.u32 %s110_s6, 4  ;;  %p63_p0 = scmp.ne.s32.totalorder %s146_s0, %s62_s10  ;;  %s15_s7 = int_to_ptr.vmem [resolvable:$true] %s14_s7 }
   0x3   :  { %p66_p1 = scmp.lt.u32.totalorder %s62_s10, %s146_s0 }
   0x5   :  { %p68_p2 = pnand %p66_p1, %p63_p0 }
   0x7   :  { %71 = shalt.err (!%p68_p2)
}
   0x8   :  { %s72_s15 = scalar_lea.vmem %s15_s7, 256  ;;  %p77_p4 = scmp.lt.s32.totalorder %s15_s7, %s15_s7 }
   0x9   :  { %p73_p3 = scmp.ne.s32.totalorder %s15_s7, %s72_s15  ;;  %p78_p5 = scmp.lt.s32.totalorder %s72_s15, %s72_s15 }
   0xb   :  { %p79_p6 = por %p78_p5, %p77_p4 }
   0xd   :  { %p80_p7 = pnand %p79_p6, %p73_p3 }
   0xf   :  { %83 = shalt.err (!%p80_p7)
}
  0x10   :  { %17 = dma.hbm_to_vmem [thread:$0]  %s146_s0, 256, %s15_s7, [#allocation3]  }
  0x11   :  { %106 = dma.done.wait [#allocation3], 256  }
  0x12   :  { %107 = vsyncadd [#allocation3], 4294967040  ;;  %v21_v0 = vld [vmem:[#allocation2] sm:$0xff]  ;;  %v22_v1 = vld [vmem:[#allocation2 + $0x8] sm:$0xff]  ;;  %s111_s0 = smov [#allocation5]  }
  0x13   :  { %v23_v2 = vmul.f32 %v21_v0, %v21_v0  ;;  %v24_v3 = vmul.f32 %v22_v1, %v22_v1  ;;  %s47_s18 = sshll.u32 %s111_s0, 4  ;;  %s48_s18 = int_to_ptr.vmem [resolvable:$true] %s47_s18 }
  0x14   :  { %s84_s19 = scalar_lea.vmem %s48_s18, 256  ;;  %p89_p9 = scmp.lt.s32.totalorder %s48_s18, %s48_s18 }
  0x15   :  { %v25_v4 = vmul.f32 0.035677407, %v23_v2  ;;  %v26_v5 = vmul.f32 0.035677407, %v24_v3  ;;  %p85_p8 = scmp.ne.s32.totalorder %s48_s18, %s84_s19  ;;  %p90_p10 = scmp.lt.s32.totalorder %s84_s19, %s84_s19 }
  0x17   :  { %v27_v6 = vadd.f32 0.7978846, %v25_v4  ;;  %v28_v7 = vadd.f32 0.7978846, %v26_v5  ;;  %p91_p11 = por %p90_p10, %p89_p9 }
  0x19   :  { %v29_v8 = vmul.f32 %v27_v6, %v21_v0  ;;  %v30_v9 = vmul.f32 %v28_v7, %v22_v1  ;;  %p92_p12 = pnand %p91_p11, %p85_p8 }
  0x1b   :  { %58 = vtanh.f32 %v29_v8 }
  0x1c   :  { %60 = vtanh.f32 %v30_v9 }
  0x25   :  { %v59_v10 = vpop.eup %58 }
  0x26   :  { %v61_v11 = vpop.eup %60  ;;  %v33_v12 = vmul.f32 0.5, %v59_v10 }
  0x27   :  { %v34_v13 = vmul.f32 0.5, %v61_v11 }
  0x28   :  { %v35_v14 = vadd.f32 0.5, %v33_v12 }
  0x29   :  { %v36_v15 = vadd.f32 0.5, %v34_v13 }
  0x2a   :  { %v37_v16 = vmul.f32 %v35_v14, %v21_v0 }
  0x2b   :  { %v38_v17 = vmul.f32 %v36_v15, %v22_v1 }
  0x2c   :  { %39 = vst [vmem:[#allocation5] sm:$0xff] %v37_v16 }
  0x2d   :  { %40 = vst [vmem:[#allocation5 + $0x8] sm:$0xff] %v38_v17 }
  0x2e   :  { %95 = shalt.err (!%p92_p12)
}
  0x2f   :  { %s96_s22 = scalar_lea.hbm %s147_s1, 256 }
  0x30   :  { %p97_p13 = scmp.ne.s32.totalorder %s147_s1, %s96_s22  ;;  %p100_p0 = scmp.lt.u32.totalorder %s96_s22, %s147_s1 }
  0x32   :  { %p102_p1 = pnand %p100_p0, %p97_p13 }
  0x34   :  { %105 = shalt.err (!%p102_p1)
}
  0x35   :  { %50 = dma.vmem_to_hbm [thread:$0]  %s48_s18, 256, %s147_s1, [#allocation4]  }
  0x36   :  { %108 = dma.done.wait [#allocation4], 256  }
  0x37   :  { %109 = vsyncadd [#allocation4], 4294967040 }
  0x38   :  { %54 = vsyncpa [#allocation3], 1 }
  0x39   :  { %55 = vsyncpa [#allocation4], 1 }

</bundles_post_ra>
